<compile_context>
chip_gen: v5e
topology: v5e:2x2
jax: 0.10.0
libtpu: 0.0.40
codegen_flags: <defaults>
</compile_context>

<pallas_src>
import jax
import jax.numpy as jnp
import numpy as np
from jax.experimental import pallas as pl
from jax.experimental.pallas import tpu as pltpu


def _hamiltonian_kernel(hr_ref, hi_ref, l_ref, or_ref, oi_ref):
    # hr_ref/hi_ref: (size, tn) pre-symmetrized real (symmetric) / imag
    #   (antisymmetric) parts of H -- symmetrization hoisted to the wrapper.
    # l_ref: (2*Bp, size) stacked [Pr; Pi] (transposed real/imag psi planes).
    L = l_ref[...]
    # Two weight pushes cover all four complex-matmul terms:
    #   L @ Hr = [Pr@Hr ; Pi@Hr],   L @ Hi = [Pr@Hi ; Pi@Hi]
    t_r = jnp.dot(L, hr_ref[...], preferred_element_type=jnp.float32)
    t_i = jnp.dot(L, hi_ref[...], preferred_element_type=jnp.float32)
    nb = or_ref.shape[0]  # padded batch, multiple of 8 -> tile-aligned slices
    # Or = Pr@Hr + Pi@Hi ,  Oi = Pi@Hr - Pr@Hi   (both lane-dense, width tn)
    or_ref[...] = t_r[:nb, :] + t_i[nb:, :]
    oi_ref[...] = t_r[nb:, :] - t_i[:nb, :]


def _pick_n_tile(size):
    # Single full block for small problems; 512-wide lane tiles for large
    # `size` (bounds VMEM well under the v7x 64 MiB ceiling and lets the
    # parallel grid axis shard across both v7x TensorCores).
    if size >= 1024 and size % 512 == 0:
        return 512
    return size


def learnable_hamiltonian_apply(h_real, h_imag, psi):
    """Apply ((H + H^H)/2) @ psi.  psi: complex64 (size, batch) -> (size, batch)."""
    size, batch = psi.shape

    # --- Hoisted, amortized per-H work: Hermitian symmetrization. ---
    hr = ((h_real + h_real.T) * 0.5).astype(jnp.float32)   # symmetric real part
    hi = ((h_imag - h_imag.T) * 0.5).astype(jnp.float32)   # antisymmetric imag part

    # --- Transposed split-complex layout: `size` on the lane axis. ---
    pr = jnp.real(psi).astype(jnp.float32).T                # (batch, size)
    pi = jnp.imag(psi).astype(jnp.float32).T

    # Pad batch to a sublane multiple so in-kernel row slices stay tile-aligned.
    bp = max(8, ((batch + 7) // 8) * 8)
    if bp != batch:
        pad = ((0, bp - batch), (0, 0))
        pr = jnp.pad(pr, pad)
        pi = jnp.pad(pi, pad)
    lhs = jnp.concatenate([pr, pi], axis=0)                 # (2*bp, size)

    tn = _pick_n_tile(size)
    grid = (size // tn,)

    h_spec = pl.BlockSpec((size, tn), lambda j: (0, j))
    l_spec = pl.BlockSpec((2 * bp, size), lambda j: (0, 0))
    o_spec = pl.BlockSpec((bp, tn), lambda j: (0, j))

    out_r, out_i = pl.pallas_call(
        _hamiltonian_kernel,
        out_shape=(jax.ShapeDtypeStruct((bp, size), jnp.float32),
                   jax.ShapeDtypeStruct((bp, size), jnp.float32)),
        grid=grid,
        in_specs=[h_spec, h_spec, l_spec],
        out_specs=(o_spec, o_spec),
        compiler_params=pltpu.CompilerParams(
            dimension_semantics=("parallel",)),
    )(hr, hi, lhs)

    # Combine explicitly (no weak-type promotion) and restore (size, batch).
    out = jax.lax.complex(out_r, out_i).T                   # (size, bp)
    return out[:, :batch]


def reference(h_real, h_imag, psi):
    H = h_real.astype(jnp.complex64) + 1j * h_imag.astype(jnp.complex64)
    H = (H + jnp.conj(H.T)) / 2
    return H @ psi


if __name__ == "__main__":
    size = 32
    batch = 8

    key = jax.random.PRNGKey(0)
    k1, k2, k3, k4 = jax.random.split(key, 4)

    # Same shapes as nn.Parameter(torch.randn(size, size)).
    h_real = jax.random.normal(k1, (size, size), dtype=jnp.float32)
    h_imag = jax.random.normal(k2, (size, size), dtype=jnp.float32)

    # Complex state(s) psi: (size, batch).
    psi = (jax.random.normal(k3, (size, batch), dtype=jnp.float32)
           + 1j * jax.random.normal(k4, (size, batch), dtype=jnp.float32)
           ).astype(jnp.complex64)

    out = learnable_hamiltonian_apply(h_real, h_imag, psi)
    out = jax.block_until_ready(out)

    ref = reference(h_real, h_imag, psi)
    np.testing.assert_allclose(np.asarray(out), np.asarray(ref),
                               rtol=1e-4, atol=1e-4)

    print("KERNEL_OK")
</pallas_src>

<mosaic_0001>
module attributes {stable_mosaic.version = 11 : i64} {
  func.func @_hamiltonian_kernel(%arg0: i32, %arg1: memref<32x32xf32, #tpu.memory_space<vmem>>, %arg2: memref<32x32xf32, #tpu.memory_space<vmem>>, %arg3: memref<16x32xf32, #tpu.memory_space<vmem>>, %arg4: memref<8x32xf32, #tpu.memory_space<vmem>>, %arg5: memref<8x32xf32, #tpu.memory_space<vmem>>) attributes {dimension_semantics = [#tpu.dimension_semantics<parallel>], iteration_bounds = array<i64: 1>, scalar_prefetch = 0 : i64, scratch_operands = 0 : i64, tpu.core_type = #tpu.core_type<tc>, window_params = [{transform_indices = @transform_0, window_bounds = array<i64: 32, 32>}, {transform_indices = @transform_1, window_bounds = array<i64: 32, 32>}, {pipeline_mode = #tpu.pipeline_mode<synchronous>, transform_indices = @transform_2, window_bounds = array<i64: 16, 32>}, {transform_indices = @transform_3, window_bounds = array<i64: 8, 32>}, {transform_indices = @transform_4, window_bounds = array<i64: 8, 32>}]} {
    %c0 = arith.constant 0 : index
    %c0_0 = arith.constant 0 : index
    %0 = vector.load %arg3[%c0, %c0_0] : memref<16x32xf32, #tpu.memory_space<vmem>>, vector<16x32xf32>
    %c0_1 = arith.constant 0 : index
    %c0_2 = arith.constant 0 : index
    %1 = vector.load %arg1[%c0_1, %c0_2] : memref<32x32xf32, #tpu.memory_space<vmem>>, vector<32x32xf32>
    %cst = arith.constant dense<0.000000e+00> : vector<16x32xf32>
    %2 = tpu.matmul %0, %1, %cst {dimension_numbers = #tpu.dot_dimension_numbers<[1], [0], [0], [1], [0, 0, 1, 1], [], []>} : vector<16x32xf32>, vector<32x32xf32>, vector<16x32xf32> -> vector<16x32xf32>
    %c0_3 = arith.constant 0 : index
    %c0_4 = arith.constant 0 : index
    %3 = vector.load %arg2[%c0_3, %c0_4] : memref<32x32xf32, #tpu.memory_space<vmem>>, vector<32x32xf32>
    %cst_5 = arith.constant dense<0.000000e+00> : vector<16x32xf32>
    %4 = tpu.matmul %0, %3, %cst_5 {dimension_numbers = #tpu.dot_dimension_numbers<[1], [0], [0], [1], [0, 0, 1, 1], [], []>} : vector<16x32xf32>, vector<32x32xf32>, vector<16x32xf32> -> vector<16x32xf32>
    %5 = vector.extract_strided_slice %2 {offsets = [0, 0], sizes = [8, 32], strides = [1, 1]} : vector<16x32xf32> to vector<8x32xf32>
    %6 = vector.extract_strided_slice %4 {offsets = [8, 0], sizes = [8, 32], strides = [1, 1]} : vector<16x32xf32> to vector<8x32xf32>
    %7 = arith.addf %5, %6 : vector<8x32xf32>
    %c0_6 = arith.constant 0 : index
    %c0_7 = arith.constant 0 : index
    %8 = vector.load %arg4[%c0_6, %c0_7] : memref<8x32xf32, #tpu.memory_space<vmem>>, vector<8x32xf32>
    tpu.vector_store %arg4[%c0_6, %c0_7], %7 {strides = array<i32>} : memref<8x32xf32, #tpu.memory_space<vmem>>, vector<8x32xf32>,
    %9 = vector.extract_strided_slice %2 {offsets = [8, 0], sizes = [8, 32], strides = [1, 1]} : vector<16x32xf32> to vector<8x32xf32>
    %10 = vector.extract_strided_slice %4 {offsets = [0, 0], sizes = [8, 32], strides = [1, 1]} : vector<16x32xf32> to vector<8x32xf32>
    %11 = arith.subf %9, %10 : vector<8x32xf32>
    %c0_8 = arith.constant 0 : index
    %c0_9 = arith.constant 0 : index
    %12 = vector.load %arg5[%c0_8, %c0_9] : memref<8x32xf32, #tpu.memory_space<vmem>>, vector<8x32xf32>
    tpu.vector_store %arg5[%c0_8, %c0_9], %11 {strides = array<i32>} : memref<8x32xf32, #tpu.memory_space<vmem>>, vector<8x32xf32>,
    return
  }
  func.func @transform_0(%arg0: i32) -> (i32, i32) {
    %c0_i32 = arith.constant 0 : i32
    %c0_i32_0 = arith.constant 0 : i32
    return %c0_i32, %arg0 : i32, i32
  }
  func.func @transform_1(%arg0: i32) -> (i32, i32) {
    %c0_i32 = arith.constant 0 : i32
    %c0_i32_0 = arith.constant 0 : i32
    return %c0_i32, %arg0 : i32, i32
  }
  func.func @transform_2(%arg0: i32) -> (i32, i32) {
    %c0_i32 = arith.constant 0 : i32
    %c0_i32_0 = arith.constant 0 : i32
    %c0_i32_1 = arith.constant 0 : i32
    return %c0_i32, %c0_i32_0 : i32, i32
  }
  func.func @transform_3(%arg0: i32) -> (i32, i32) {
    %c0_i32 = arith.constant 0 : i32
    %c0_i32_0 = arith.constant 0 : i32
    return %c0_i32, %arg0 : i32, i32
  }
  func.func @transform_4(%arg0: i32) -> (i32, i32) {
    %c0_i32 = arith.constant 0 : i32
    %c0_i32_0 = arith.constant 0 : i32
    return %c0_i32, %arg0 : i32, i32
  }
}

</mosaic_0001>

<bundles_post_ra>
// kernel: tpu_custom_call.1
= control target key start
LH: loop header
LB: loop body
LE: loop exit
PB: predicated region body
PF: predicated region fallthrough
CT: control target
= control target key end

     0   :  { %10 = vsyncpa [#allocation3], 0  ;;  %s366_s0 = inlined_call_operand.hbm [shape: f32[32,32], index: 0, kind: input, shape index: {}]   ;;  %s367_s1 = inlined_call_operand.hbm [shape: f32[32,32], index: 1, kind: input, shape index: {}]   ;;  %s368_s2 = inlined_call_operand.hbm [shape: f32[16,32], index: 2, kind: input, shape index: {}]   ;;  %s369_s3 = inlined_call_operand.hbm [shape: f32[8,32], index: 3, kind: output, shape index: {0}]   ;;  %s370_s4 = inlined_call_operand.hbm [shape: f32[8,32], index: 4, kind: output, shape index: {1}]  }
   0x1   :  { %11 = vsyncpa [#allocation6], 0 }
   0x2   :  { %12 = vsyncpa [#allocation4], 0 }
   0x3   :  { %13 = vsyncpa [#allocation10], 0  ;;  %s31_s17 = sshll.u32 %s367_s1, 4  ;;  %s313_s18 = smov [#allocation5]   ;;  %s32_s17 = int_to_ptr.hbm [resolvable:$true] %s31_s17 }
   0x4   :  { %s33_s19 = sshll.u32 %s313_s18, 4  ;;  %s18_s22 = sshll.u32 %s366_s0, 4  ;;  %s34_s19 = int_to_ptr.vmem [resolvable:$true] %s33_s19  ;;  %s19_s22 = int_to_ptr.hbm [resolvable:$true] %s18_s22 }
   0x5   :  { %s314_s23 = smov 128   ;;  %s315_s24 = smov 8  }
   0x6   :  { %39 = dma.hbm_to_vmem [thread:$0]  %s32_s17, 512, %s34_s19, [#allocation6], %s314_s23, %s314_s23, %s315_s24  }
   0x7   :  { %s316_s25 = smov [#allocation2]   ;;  %s44_s29 = sshll.u32 %s368_s2, 4  ;;  %s45_s29 = int_to_ptr.hbm [resolvable:$true] %s44_s29 }
   0x8   :  { %s20_s26 = sshll.u32 %s316_s25, 4  ;;  %s317_s1 = smov [#allocation7]   ;;  %s21_s26 = int_to_ptr.vmem [resolvable:$true] %s20_s26 }
   0x9   :  { %26 = dma.hbm_to_vmem [thread:$0]  %s19_s22, 512, %s21_s26, [#allocation3], %s314_s23, %s314_s23, %s315_s24  }
   0xa   :  { %s46_s30 = sshll.u32 %s317_s1, 4  ;;  %s47_s30 = int_to_ptr.vmem [resolvable:$true] %s46_s30 }
   0xb   :  { %52 = dma.hbm_to_vmem [thread:$0]  %s45_s29, 256, %s47_s30, [#allocation6], %s314_s23, %s314_s23, %s315_s24  }
   0xc   :  { %305 = dma.done.wait [#allocation3], 512  }
   0xd   :  { %306 = vsyncadd [#allocation3], 4294966784 }
   0xe   :  { %307 = dma.done.wait [#allocation6], 768  }
   0xf   :  { %308 = vsyncadd [#allocation6], 4294966528  ;;  %v70_v0 = vld [vmem:[#allocation2 + $0x18] sm:$0xff]  ;;  %v69_v2 = vld [vmem:[#allocation2 + $0x10] sm:$0xff]  ;;  %vm71_vm0 = vcmask 261120   ;;  %s318_s0 = smov [#allocation9]  }
  0x10   :  { %v104_v1 = vld [vmem:[#allocation5 + $0x18] sm:$0xff]  ;;  %170 = vmatpush.msra.mxu2 %v70_v0  ;;  %v103_v3 = vld [vmem:[#allocation5 + $0x10] sm:$0xff]  ;;  %v68_v4 = vld [vmem:[#allocation2 + $0x8] sm:$0xff]  ;;  %90 = vmatpush.msra.mxu0 %v70_v0  ;;  %s148_s2 = sshll.u32 %s318_s0, 4  ;;  %s150_s7 = sshll.u32 %s370_s4, 4  ;;  %s149_s2 = int_to_ptr.vmem [resolvable:$true] %s148_s2  ;;  %s151_s7 = int_to_ptr.hbm [resolvable:$true] %s150_s7 }
  0x11   :  { %174 = vmatpush.msra.mxu3 %v104_v1  ;;  %v102_v5 = vld [vmem:[#allocation5 + $0x8] sm:$0xff]  ;;  %117 = vmatpush.msra.mxu1 %v104_v1  ;;  %v67_v6 = vld [vmem:[#allocation2] sm:$0xff]  ;;  %s319_s8 = smov [#allocation8]   ;;  %s139_s12 = sshll.u32 %s369_s3, 4  ;;  %s140_s12 = int_to_ptr.hbm [resolvable:$true] %s139_s12 }
  0x12   :  { %171 = vmatpush.msra.mxu2 %v69_v2  ;;  %v101_v7 = vld [vmem:[#allocation5] sm:$0xff]  ;;  %91 = vmatpush.msra.mxu0 %v69_v2  ;;  %v66_v8 = vld [vmem:[#allocation7 + $0x8] sm:$0xff]  ;;  %s137_s9 = sshll.u32 %s319_s8, 4  ;;  %s138_s9 = int_to_ptr.vmem [resolvable:$true] %s137_s9 }
  0x13   :  { %175 = vmatpush.msra.mxu3 %v103_v3  ;;  %118 = vmatpush.msra.mxu1 %v103_v3  ;;  %v65_v9 = vld [vmem:[#allocation7] sm:$0xff] }
  0x14   :  { %172 = vmatpush.msra.mxu2 %v68_v4  ;;  %92 = vmatpush.msra.mxu0 %v68_v4 }
  0x15   :  { %176 = vmatpush.msra.mxu3 %v102_v5  ;;  %119 = vmatpush.msra.mxu1 %v102_v5 }
  0x16   :  { %173 = vmatpush.msra.mxu2 %v67_v6  ;;  %93 = vmatpush.msra.mxu0 %v67_v6 }
  0x17   :  { %177 = vmatpush.msra.mxu3 %v101_v7  ;;  %167 = vmatmul.msk.f32.vlgmr.msra.gmra.mxu2 %vm71_vm0, %v66_v8 }
  0x18   :  { %169 = vmatmul.msk.f32.vlgmr.msra.gmra.mxu3 %vm71_vm0, %v66_v8  ;;  %120 = vmatpush.msra.mxu1 %v101_v7 }
  0x19   :  { %166 = vmatmul.msk.f32.vlgmr.msra.gmra.mxu0 %vm71_vm0, %v65_v9  ;;  %168 = vmatmul.msk.f32.vlgmr.msra.gmra.mxu1 %vm71_vm0, %v65_v9 }
  0x96   :  { %v95_v10 = vpop.f32.mrf.mxu0  ;;  %v122_v11 = vpop.f32.mrf.mxu1 }
  0x9a   :  { %v98_v12 = vpop.f32.mrf.mxu2 }
  0x9b   :  { %v125_v13 = vpop.f32.mrf.mxu3  ;;  %v130_v14 = vsub.f32 %v98_v12, %v122_v11 }
  0x9c   :  { %v128_v15 = vadd.f32 %v125_v13, %v95_v10 }
  0x9d   :  { %131 = vst.msk [vmem:[#allocation9] sm:$0xff] %vm71_vm0, %v130_v14 }
  0x9e   :  { %129 = vst.msk [vmem:[#allocation8] sm:$0xff] %vm71_vm0, %v128_v15  ;;  %153 = dma.vmem_to_hbm [thread:$0]  %s149_s2, 128, %s151_s7, [#allocation10]  }
  0x9f   :  { %142 = dma.vmem_to_hbm [thread:$0]  %s138_s9, 128, %s140_s12, [#allocation4]  }
  0xa0   :  { %309 = dma.done.wait [#allocation4], 128  }
  0xa1   :  { %310 = vsyncadd [#allocation4], 4294967168 }
  0xa2   :  { %311 = dma.done.wait [#allocation10], 128  }
  0xa3   :  { %312 = vsyncadd [#allocation10], 4294967168 }
  0xa4   :  { %162 = vsyncpa [#allocation3], 1 }
  0xa5   :  { %163 = vsyncpa [#allocation6], 1 }
  0xa6   :  { %164 = vsyncpa [#allocation4], 1 }
  0xa7   :  { %165 = vsyncpa [#allocation10], 1 }

</bundles_post_ra>
